<compile_context>
chip_gen: v7x
topology: tpu7x:2x2x1
jax: 0.10.0
libtpu: 0.0.40
codegen_flags: <defaults>
</compile_context>

<pallas_src>
import jax
import jax.numpy as jnp
from jax.experimental import pallas as pl
from jax.experimental.pallas import tpu as pltpu

EPS = 1e-5


def _round_up(v, m):
    return ((v + m - 1) // m) * m


# --------------------------------------------------------------------------
# Kernels
# --------------------------------------------------------------------------

def _conv1x1_stats_kernel(x_ref, w_ref, t_ref, s_ref, q_ref):
    """t = x @ w (1x1 conv) ; accumulate per-channel sum / sum-of-squares."""
    b = pl.program_id(0)

    @pl.when(b == 0)
    def _():
        s_ref[...] = jnp.zeros_like(s_ref)
        q_ref[...] = jnp.zeros_like(q_ref)

    t = jnp.dot(x_ref[0], w_ref[...], preferred_element_type=jnp.float32)
    t_ref[0] = t.astype(t_ref.dtype)
    s_ref[...] += jnp.sum(t, axis=0, keepdims=True)
    q_ref[...] += jnp.sum(t * t, axis=0, keepdims=True)


def _bnrelu_conv3_stats_kernel(t1_ref, sc_ref, sh_ref, w_ref,
                               t2_ref, s_ref, q_ref):
    """a = relu(bn1(t1)); t2 = conv_k3(a) via aligned matmuls + pltpu.roll."""
    b = pl.program_id(0)

    @pl.when(b == 0)
    def _():
        s_ref[...] = jnp.zeros_like(s_ref)
        q_ref[...] = jnp.zeros_like(q_ref)

    L = t1_ref.shape[1]
    a = jnp.maximum(t1_ref[0].astype(jnp.float32) * sc_ref[...] + sh_ref[...], 0.0)
    a = a.astype(w_ref.dtype)

    # tap k=0 reads x[l-1], k=1 reads x[l], k=2 reads x[l+1]  (pad=1)
    m0 = jnp.dot(a, w_ref[0], preferred_element_type=jnp.float32)
    m1 = jnp.dot(a, w_ref[1], preferred_element_type=jnp.float32)
    m2 = jnp.dot(a, w_ref[2], preferred_element_type=jnp.float32)

    idx = jax.lax.broadcasted_iota(jnp.int32, (L, 1), 0)
    t2 = m1
    t2 = t2 + jnp.where(idx >= 1, pltpu.roll(m0, shift=1, axis=0), 0.0)
    t2 = t2 + jnp.where(idx <= L - 2, pltpu.roll(m2, shift=L - 1, axis=0), 0.0)

    t2_ref[0] = t2.astype(t2_ref.dtype)
    s_ref[...] += jnp.sum(t2, axis=0, keepdims=True)
    q_ref[...] += jnp.sum(t2 * t2, axis=0, keepdims=True)


def _bnrelu_conv1x1_stats_pool_kernel(t2_ref, sc_ref, sh_ref, w_ref,
                                      t3_ref, s_ref, q_ref, p_ref):
    """a = relu(bn2(t2)); t3 = a @ w (1x1); global stats + per-batch SE sum."""
    b = pl.program_id(0)

    @pl.when(b == 0)
    def _():
        s_ref[...] = jnp.zeros_like(s_ref)
        q_ref[...] = jnp.zeros_like(q_ref)

    a = jnp.maximum(t2_ref[0].astype(jnp.float32) * sc_ref[...] + sh_ref[...], 0.0)
    t3 = jnp.dot(a.astype(w_ref.dtype), w_ref[...],
                 preferred_element_type=jnp.float32)
    t3_ref[0] = t3.astype(t3_ref.dtype)
    colsum = jnp.sum(t3, axis=0, keepdims=True)
    s_ref[...] += colsum
    q_ref[...] += jnp.sum(t3 * t3, axis=0, keepdims=True)
    p_ref[0] = colsum


def _bn3_se_residual_kernel(t3_ref, x_ref, p_ref, sc_ref, sh_ref,
                            wf1_ref, wf2_ref, o_ref):
    """bn3, squeeze-excite gating (per-batch MLP), residual add, final relu."""
    L = t3_ref.shape[1]
    sc = sc_ref[...]
    sh = sh_ref[...]
    a3 = t3_ref[0].astype(jnp.float32) * sc + sh            # (L, C4p) = bn3(t3)
    pm = p_ref[0] * (1.0 / L) * sc + sh                     # (1, C4p) = mean_L bn3
    hid = jnp.maximum(
        jnp.dot(pm.astype(wf1_ref.dtype), wf1_ref[...],
                preferred_element_type=jnp.float32), 0.0)
    gate = jax.nn.sigmoid(
        jnp.dot(hid.astype(wf2_ref.dtype), wf2_ref[...],
                preferred_element_type=jnp.float32))        # (1, C4p)
    o = a3 * gate + x_ref[0].astype(jnp.float32)
    o_ref[0] = jnp.maximum(o, 0.0)


# --------------------------------------------------------------------------
# Wrapper
# --------------------------------------------------------------------------

def se_bottleneck(x_ncl, params, *, compute_dtype=jnp.bfloat16):
    """SEBottleneck forward (stride=1, downsample=None), training-mode BN.

    x_ncl: (N, C, L) float32, PyTorch layout, with C == planes*4 (required by
    the residual add when downsample is None).  Conv weights in PyTorch
    (Cout, Cin, K) layout, Linear weights in (out, in) layout.
    """
    N, cin, L = x_ncl.shape
    planes = params["w1"].shape[0]
    c4 = 4 * planes
    assert cin == c4, "downsample=None SEBottleneck requires inplanes == planes*4"
    hdim = params["fc1"].shape[0]

    c4p = _round_up(c4, 128)
    pp = _round_up(planes, 128)
    hp = _round_up(hdim, 128)
    cnt = jnp.float32(N * L)
    f32 = jnp.float32

    def pad2(a, r, c):
        return jnp.pad(a.astype(f32), ((0, r - a.shape[0]), (0, c - a.shape[1])))

    def pad_vec(v, c):
        return jnp.pad(v.astype(f32), (0, c - v.shape[0])).reshape(1, c)

    # channels-last lane-padded input; stored once, reused as residual.
    x_nlc = jnp.transpose(x_ncl, (0, 2, 1)).astype(f32)
    x_p = jnp.pad(x_nlc, ((0, 0), (0, 0), (0, c4p - c4))).astype(compute_dtype)

    w1p = pad2(params["w1"][:, :, 0].T, c4p, pp).astype(compute_dtype)   # (c4p, pp)
    w2p = jnp.stack([pad2(params["w2"][:, :, k].T, pp, pp)
                     for k in range(3)]).astype(compute_dtype)           # (3, pp, pp)
    w3p = pad2(params["w3"][:, :, 0].T, pp, c4p).astype(compute_dtype)   # (pp, c4p)
    wf1p = pad2(params["fc1"].T, c4p, hp).astype(compute_dtype)          # (c4p, hp)
    wf2p = pad2(params["fc2"].T, hp, c4p).astype(compute_dtype)          # (hp, c4p)

    g1, b1 = pad_vec(params["g1"], pp), pad_vec(params["b1"], pp)
    g2, b2 = pad_vec(params["g2"], pp), pad_vec(params["b2"], pp)
    g3, b3 = pad_vec(params["g3"], c4p), pad_vec(params["b3"], c4p)

    arb = pltpu.CompilerParams(dimension_semantics=("arbitrary",))
    par = pltpu.CompilerParams(dimension_semantics=("parallel",))

    def bn_affine(s, q, gamma, beta):
        mean = s / cnt
        var = jnp.maximum(q / cnt - mean * mean, 0.0)     # biased (training) var
        scale = gamma * jax.lax.rsqrt(var + EPS)
        return scale, beta - mean * scale

    def row_spec(c):
        return pl.BlockSpec((1, L, c), lambda b: (b, 0, 0))

    def vec_spec(c):
        return pl.BlockSpec((1, c), lambda b: (0, 0))

    # -- stage 1: conv1 (1x1) + bn1 batch statistics -------------------------
    # TODO(synk): for very long L, additionally tile the length axis (the 1x1
    #             stages are pointwise; the k=3 stage would need a halo).
    t1, s1, q1 = pl.pallas_call(
        _conv1x1_stats_kernel,
        grid=(N,),
        in_specs=[row_spec(c4p),
                  pl.BlockSpec((c4p, pp), lambda b: (0, 0))],
        out_specs=[row_spec(pp), vec_spec(pp), vec_spec(pp)],
        out_shape=(jax.ShapeDtypeStruct((N, L, pp), compute_dtype),
                   jax.ShapeDtypeStruct((1, pp), f32),
                   jax.ShapeDtypeStruct((1, pp), f32)),
        compiler_params=arb,
    )(x_p, w1p)
    sc1, sh1 = bn_affine(s1, q1, g1, b1)

    # -- stage 2: bn1+relu, conv2 (k=3, pad=1) + bn2 statistics --------------
    t2, s2, q2 = pl.pallas_call(
        _bnrelu_conv3_stats_kernel,
        grid=(N,),
        in_specs=[row_spec(pp), vec_spec(pp), vec_spec(pp),
                  pl.BlockSpec((3, pp, pp), lambda b: (0, 0, 0))],
        out_specs=[row_spec(pp), vec_spec(pp), vec_spec(pp)],
        out_shape=(jax.ShapeDtypeStruct((N, L, pp), compute_dtype),
                   jax.ShapeDtypeStruct((1, pp), f32),
                   jax.ShapeDtypeStruct((1, pp), f32)),
        compiler_params=arb,
    )(t1, sc1, sh1, w2p)
    sc2, sh2 = bn_affine(s2, q2, g2, b2)

    # -- stage 3: bn2+relu, conv3 (1x1) + bn3 statistics + per-batch SE pool -
    t3, s3, q3, pool3 = pl.pallas_call(
        _bnrelu_conv1x1_stats_pool_kernel,
        grid=(N,),
        in_specs=[row_spec(pp), vec_spec(pp), vec_spec(pp),
                  pl.BlockSpec((pp, c4p), lambda b: (0, 0))],
        out_specs=[row_spec(c4p), vec_spec(c4p), vec_spec(c4p),
                   pl.BlockSpec((1, 1, c4p), lambda b: (b, 0, 0))],
        out_shape=(jax.ShapeDtypeStruct((N, L, c4p), compute_dtype),
                   jax.ShapeDtypeStruct((1, c4p), f32),
                   jax.ShapeDtypeStruct((1, c4p), f32),
                   jax.ShapeDtypeStruct((N, 1, c4p), f32)),
        compiler_params=arb,
    )(t2, sc2, sh2, w3p)
    sc3, sh3 = bn_affine(s3, q3, g3, b3)

    # -- stage 4: bn3, SE gating, residual add, final relu -------------------
    out_p = pl.pallas_call(
        _bn3_se_residual_kernel,
        grid=(N,),
        in_specs=[row_spec(c4p), row_spec(c4p),
                  pl.BlockSpec((1, 1, c4p), lambda b: (b, 0, 0)),
                  vec_spec(c4p), vec_spec(c4p),
                  pl.BlockSpec((c4p, hp), lambda b: (0, 0)),
                  pl.BlockSpec((hp, c4p), lambda b: (0, 0))],
        out_specs=row_spec(c4p),
        out_shape=jax.ShapeDtypeStruct((N, L, c4p), f32),
        compiler_params=par,
    )(t3, x_p, pool3, sc3, sh3, wf1p, wf2p)

    return jnp.transpose(out_p[:, :, :c4], (0, 2, 1))     # back to (N, C, L)


# --------------------------------------------------------------------------
# Pure-JAX reference mirroring the PyTorch SEBottleneck forward (NCL layout)
# --------------------------------------------------------------------------

def _reference(x, p):
    def conv(h, w, pad):
        return jax.lax.conv_general_dilated(
            h, w, window_strides=(1,), padding=((pad, pad),),
            dimension_numbers=("NCH", "OIH", "NCH"))

    def bn(h, g, b):
        mean = jnp.mean(h, axis=(0, 2), keepdims=True)
        var = jnp.mean((h - mean) ** 2, axis=(0, 2), keepdims=True)
        return (h - mean) * jax.lax.rsqrt(var + EPS) * g.reshape(1, -1, 1) \
            + b.reshape(1, -1, 1)

    h = jax.nn.relu(bn(conv(x, p["w1"], 0), p["g1"], p["b1"]))
    h = jax.nn.relu(bn(conv(h, p["w2"], 1), p["g2"], p["b2"]))
    h = bn(conv(h, p["w3"], 0), p["g3"], p["b3"])
    y = jnp.mean(h, axis=2)                                   # SE squeeze
    y = jax.nn.relu(y @ p["fc1"].T)
    y = jax.nn.sigmoid(y @ p["fc2"].T)
    out = h * y[:, :, None] + x
    return jax.nn.relu(out)


if __name__ == "__main__":
    # Small deterministic setup: batch=2, planes=4 -> channels=16, length=16.
    N, planes, L = 2, 4, 16
    c4 = planes * 4            # inplanes == planes*4 == 16 (residual constraint)
    hdim = max(c4 // 16, 1)    # SE reduction=16 -> hidden dim 1

    key = jax.random.PRNGKey(0)
    ks = jax.random.split(key, 12)
    x = jax.random.normal(ks[0], (N, c4, L), dtype=jnp.float32)
    params = dict(
        w1=0.3 * jax.random.normal(ks[1], (planes, c4, 1), jnp.float32),
        g1=1.0 + 0.1 * jax.random.normal(ks[2], (planes,), jnp.float32),
        b1=0.1 * jax.random.normal(ks[3], (planes,), jnp.float32),
        w2=0.3 * jax.random.normal(ks[4], (planes, planes, 3), jnp.float32),
        g2=1.0 + 0.1 * jax.random.normal(ks[5], (planes,), jnp.float32),
        b2=0.1 * jax.random.normal(ks[6], (planes,), jnp.float32),
        w3=0.3 * jax.random.normal(ks[7], (c4, planes, 1), jnp.float32),
        g3=1.0 + 0.1 * jax.random.normal(ks[8], (c4,), jnp.float32),
        b3=0.1 * jax.random.normal(ks[9], (c4,), jnp.float32),
        fc1=0.5 * jax.random.normal(ks[10], (hdim, c4), jnp.float32),
        fc2=0.5 * jax.random.normal(ks[11], (c4, hdim), jnp.float32),
    )

    ref = _reference(x, params)

    # f32 compute path: tight check against the reference.
    out32 = jax.block_until_ready(se_bottleneck(x, params, compute_dtype=jnp.float32))
    assert out32.shape == (N, c4, L), out32.shape
    assert jnp.allclose(out32, ref, rtol=1e-3, atol=1e-3), \
        f"f32 max abs err {jnp.max(jnp.abs(out32 - ref))}"

    # bf16 matmul-operand path (perf default): loose check.
    outbf = jax.block_until_ready(se_bottleneck(x, params, compute_dtype=jnp.bfloat16))
    assert outbf.shape == (N, c4, L), outbf.shape
    assert jnp.allclose(outbf, ref, rtol=5e-2, atol=5e-2), \
        f"bf16 max abs err {jnp.max(jnp.abs(outbf - ref))}"

    print("KERNEL_OK")
</pallas_src>

<mosaic_0001>
module attributes {stable_mosaic.version = 11 : i64} {
  func.func @_conv1x1_stats_kernel(%arg0: i32, %arg1: memref<1x16x128xf32, #tpu.memory_space<vmem>>, %arg2: memref<128x128xf32, #tpu.memory_space<vmem>>, %arg3: memref<1x16x128xf32, #tpu.memory_space<vmem>>, %arg4: memref<1x128xf32, #tpu.memory_space<vmem>>, %arg5: memref<1x128xf32, #tpu.memory_space<vmem>>) attributes {dimension_semantics = [#tpu.dimension_semantics<arbitrary>], iteration_bounds = array<i64: 2>, scalar_prefetch = 0 : i64, scratch_operands = 0 : i64, tpu.core_type = #tpu.core_type<tc>, window_params = [{transform_indices = @transform_0, window_bounds = array<i64: 1, 16, 128>}, {pipeline_mode = #tpu.pipeline_mode<synchronous>, transform_indices = @transform_1, window_bounds = array<i64: 128, 128>}, {transform_indices = @transform_2, window_bounds = array<i64: 1, 16, 128>}, {pipeline_mode = #tpu.pipeline_mode<synchronous>, transform_indices = @transform_3, window_bounds = array<i64: 1, 128>}, {pipeline_mode = #tpu.pipeline_mode<synchronous>, transform_indices = @transform_4, window_bounds = array<i64: 1, 128>}]} {
    %c0_i32 = arith.constant 0 : i32
    %0 = arith.cmpi eq, %arg0, %c0_i32 : i32
    %1 = arith.extui %0 : i1 to i32
    %c0_i32_0 = arith.constant 0 : i32
    %2 = arith.cmpi ne, %1, %c0_i32_0 : i32
    scf.if %2 {
      %cst_18 = arith.constant 0.000000e+00 : f32
      %21 = vector.broadcast %cst_18 : f32 to vector<1x128xf32>
      %c0_19 = arith.constant 0 : index
      %c0_20 = arith.constant 0 : index
      %22 = vector.load %arg4[%c0_19, %c0_20] : memref<1x128xf32, #tpu.memory_space<vmem>>, vector<1x128xf32>
      tpu.vector_store %arg4[%c0_19, %c0_20], %21 {strides = array<i32>} : memref<1x128xf32, #tpu.memory_space<vmem>>, vector<1x128xf32>,
      %cst_21 = arith.constant 0.000000e+00 : f32
      %23 = vector.broadcast %cst_21 : f32 to vector<1x128xf32>
      %c0_22 = arith.constant 0 : index
      %c0_23 = arith.constant 0 : index
      %24 = vector.load %arg5[%c0_22, %c0_23] : memref<1x128xf32, #tpu.memory_space<vmem>>, vector<1x128xf32>
      tpu.vector_store %arg5[%c0_22, %c0_23], %23 {strides = array<i32>} : memref<1x128xf32, #tpu.memory_space<vmem>>, vector<1x128xf32>,
    } else {
    }
    %c0 = arith.constant 0 : index
    %c0_1 = arith.constant 0 : index
    %c0_2 = arith.constant 0 : index
    %3 = vector.load %arg1[%c0, %c0_1, %c0_2] : memref<1x16x128xf32, #tpu.memory_space<vmem>>, vector<1x16x128xf32>
    %4 = vector.shape_cast %3 : vector<1x16x128xf32> to vector<16x128xf32>
    %c0_3 = arith.constant 0 : index
    %c0_4 = arith.constant 0 : index
    %5 = vector.load %arg2[%c0_3, %c0_4] : memref<128x128xf32, #tpu.memory_space<vmem>>, vector<128x128xf32>
    %cst = arith.constant dense<0.000000e+00> : vector<16x128xf32>
    %6 = tpu.matmul %4, %5, %cst {dimension_numbers = #tpu.dot_dimension_numbers<[1], [0], [0], [1], [0, 0, 1, 1], [], []>} : vector<16x128xf32>, vector<128x128xf32>, vector<16x128xf32> -> vector<16x128xf32>
    %c0_5 = arith.constant 0 : index
    %c0_6 = arith.constant 0 : index
    %c0_7 = arith.constant 0 : index
    %7 = vector.load %arg3[%c0_5, %c0_6, %c0_7] : memref<1x16x128xf32, #tpu.memory_space<vmem>>, vector<1x16x128xf32>
    %8 = vector.shape_cast %7 : vector<1x16x128xf32> to vector<16x128xf32>
    %9 = vector.shape_cast %6 : vector<16x128xf32> to vector<1x16x128xf32>
    tpu.vector_store %arg3[%c0_5, %c0_6, %c0_7], %9 {strides = array<i32>} : memref<1x16x128xf32, #tpu.memory_space<vmem>>, vector<1x16x128xf32>,
    %c0_8 = arith.constant 0 : index
    %c0_9 = arith.constant 0 : index
    %10 = vector.load %arg4[%c0_8, %c0_9] : memref<1x128xf32, #tpu.memory_space<vmem>>, vector<1x128xf32>
    %cst_10 = arith.constant dense<0.000000e+00> : vector<128xf32>
    %11 = vector.multi_reduction <add>, %6, %cst_10 [0] : vector<16x128xf32> to vector<128xf32>
    %12 = vector.shape_cast %11 : vector<128xf32> to vector<1x128xf32>
    %13 = arith.addf %10, %12 : vector<1x128xf32>
    %c0_11 = arith.constant 0 : index
    %c0_12 = arith.constant 0 : index
    %14 = vector.load %arg4[%c0_11, %c0_12] : memref<1x128xf32, #tpu.memory_space<vmem>>, vector<1x128xf32>
    tpu.vector_store %arg4[%c0_11, %c0_12], %13 {strides = array<i32>} : memref<1x128xf32, #tpu.memory_space<vmem>>, vector<1x128xf32>,
    %c0_13 = arith.constant 0 : index
    %c0_14 = arith.constant 0 : index
    %15 = vector.load %arg5[%c0_13, %c0_14] : memref<1x128xf32, #tpu.memory_space<vmem>>, vector<1x128xf32>
    %16 = arith.mulf %6, %6 : vector<16x128xf32>
    %cst_15 = arith.constant dense<0.000000e+00> : vector<128xf32>
    %17 = vector.multi_reduction <add>, %16, %cst_15 [0] : vector<16x128xf32> to vector<128xf32>
    %18 = vector.shape_cast %17 : vector<128xf32> to vector<1x128xf32>
    %19 = arith.addf %15, %18 : vector<1x128xf32>
    %c0_16 = arith.constant 0 : index
    %c0_17 = arith.constant 0 : index
    %20 = vector.load %arg5[%c0_16, %c0_17] : memref<1x128xf32, #tpu.memory_space<vmem>>, vector<1x128xf32>
    tpu.vector_store %arg5[%c0_16, %c0_17], %19 {strides = array<i32>} : memref<1x128xf32, #tpu.memory_space<vmem>>, vector<1x128xf32>,
    return
  }
  func.func @transform_0(%arg0: i32) -> (i32, i32, i32) {
    %c0_i32 = arith.constant 0 : i32
    %c0_i32_0 = arith.constant 0 : i32
    %c0_i32_1 = arith.constant 0 : i32
    return %arg0, %c0_i32, %c0_i32_0 : i32, i32, i32
  }
  func.func @transform_1(%arg0: i32) -> (i32, i32) {
    %c0_i32 = arith.constant 0 : i32
    %c0_i32_0 = arith.constant 0 : i32
    %c0_i32_1 = arith.constant 0 : i32
    return %c0_i32, %c0_i32_0 : i32, i32
  }
  func.func @transform_2(%arg0: i32) -> (i32, i32, i32) {
    %c0_i32 = arith.constant 0 : i32
    %c0_i32_0 = arith.constant 0 : i32
    %c0_i32_1 = arith.constant 0 : i32
    return %arg0, %c0_i32, %c0_i32_0 : i32, i32, i32
  }
  func.func @transform_3(%arg0: i32) -> (i32, i32) {
    %c0_i32 = arith.constant 0 : i32
    %c0_i32_0 = arith.constant 0 : i32
    %c0_i32_1 = arith.constant 0 : i32
    return %c0_i32, %c0_i32_0 : i32, i32
  }
  func.func @transform_4(%arg0: i32) -> (i32, i32) {
    %c0_i32 = arith.constant 0 : i32
    %c0_i32_0 = arith.constant 0 : i32
    %c0_i32_1 = arith.constant 0 : i32
    return %c0_i32, %c0_i32_0 : i32, i32
  }
}

</mosaic_0001>

<bundles_post_ra>
// kernel: tpu_custom_call.1
= control target key start
LH: loop header
LB: loop body
LE: loop exit
PB: predicated region body
PF: predicated region fallthrough
CT: control target
= control target key end

     0   :  { %10 = vsyncpa [#allocation3], 0  ;;  %s1162_s0 = inlined_call_operand.hbm [shape: f32[2,16,128], index: 0, kind: input, shape index: {}]   ;;  %s1163_s1 = inlined_call_operand.hbm [shape: f32[128,128], index: 1, kind: input, shape index: {}]   ;;  %s1164_s2 = inlined_call_operand.hbm [shape: f32[2,16,128], index: 2, kind: output, shape index: {0}]   ;;  %s1165_s3 = inlined_call_operand.hbm [shape: f32[1,128], index: 3, kind: output, shape index: {1}]   ;;  %s1166_s4 = inlined_call_operand.hbm [shape: f32[1,128], index: 4, kind: output, shape index: {2}]  }
   0x1   :  { %12 = vsyncpa [#allocation3 + $0x1], 0 }
   0x2   :  { %13 = vsyncpa [#allocation6], 0 }
   0x3   :  { %14 = vsyncpa [#allocation4], 0 }
   0x4   :  { %16 = vsyncpa [#allocation4 + $0x1], 0 }
   0x5   :  { %17 = vsyncpa [#allocation9], 0  ;;  %s895_s15 = smov 0   ;;  %s897_s16 = smov 0  }
   0x6   :  { %s899_s17 = smov 0   ;;  %s901_s18 = smov 0  }
   0x7 LB: > { %s916_s19 = sadd.s32 4294967295, %s858_s18   ;;  %s490_s20 = sadd.s32 4294967294, %s858_s18   ;;  %s858_s18 = sphi %s901_s18, %s1194_s18   ;;  %s854_s17 = sphi %s899_s17, %s1193_s17   ;;  %s850_s16 = sphi %s897_s16, %s1192_s16   ;;  %s846_s15 = sphi %s895_s15, %s1191_s15  }
   0x8   : > { %p43_p0 = scmp.ne.s32.totalorder %s850_s16, %s846_s15  ;;  %p1167_p1 = scmp.eq.s32.totalorder %s916_s19, 0 }
   0x9   : > { %p94_p3 = scmp.eq.s32.totalorder %s490_s20, 1  ;;  %p491_p5 = scmp.ge.s32.totalorder %s858_s18, 1 }
   0xa   : > { %p925_p4 = por %p1167_p1, %p43_p0  ;;  %p143_p7 = scmp.lt.s32.totalorder %s858_s18, 3 }
   0xb   : > { %p930_p6 = por %p94_p3, %p43_p0  ;;  %s860_s24 = smov [#allocation5]  }
   0xc   : > { %s1170_s21 = scalar_select %p925_p4, 1, 0 }
   0xd   : > { %s1171_s22 = scalar_select %p930_p6, 1, 0 }
   0xe   : > { %p936_p9 = pnand %p491_p5, %p143_p7  ;;  %s155_s25 = sshll.u32 %s860_s24, 4  ;;  %s940_s25 = int_to_ptr.vmem [resolvable:$true] %s155_s25 }
   0xf   : > { %s952_s27 = sadd.s32 1, %s858_s18   ;;  %s30_s28 = sadd.s32 1, %s854_s17 }
  0x10   : > { %s1172_s23 = scalar_select %p936_p9, 1, 0 }
  0x11   : > { %p614_p10 = pneg %p936_p9  ;;  %s27_s29 = ssub.s32 %s858_s18, %s952_s27 }
  0x12   : > { %s674_s6 = scalar_lea.hbm %s1163_s1, 2048 }
  0x13   : > { %p947_p12 = pnand %p614_p10, %p1167_p1  ;;  %p675_p13 = scmp.ne.s32.totalorder %s1163_s1, %s674_s6 }
  0x14   : > { %p681_p7 = scmp.lt.u32.totalorder %s674_s6, %s1163_s1 }
  0x15   : > { %p676_p0 = pneg %p947_p12 }
  0x17   : > { %p677_p3 = pnand %p676_p0, %p675_p13 }
  0x19   : > { %p678_p5 = pneg %p677_p3 }
  0x1b   : > { %p683_p10 = pnand %p681_p7, %p678_p5 }
  0x1d   : > { %686 = shalt.err (!%p683_p10)
}
  0x1e   : > { %s687_s11 = scalar_lea.vmem %s940_s25, 2048  ;;  %p695_p2 = scmp.lt.s32.totalorder %s940_s25, %s940_s25 }
  0x1f   : > { %p688_p11 = scmp.ne.s32.totalorder %s940_s25, %s687_s11  ;;  %p696_p6 = scmp.lt.s32.totalorder %s687_s11, %s687_s11 }
  0x21   : > { %p690_p8 = pnand %p688_p11, %p676_p0  ;;  %p697_p4 = por %p696_p6, %p695_p2 }
  0x23   : > { %p691_p1 = pneg %p690_p8 }
  0x25   : > { %p698_p9 = pnand %p697_p4, %p691_p1 }
  0x27   : > { %701 = shalt.err (!%p698_p9)
}
  0x28   : > { %s861_s12 = smov 128   ;;  %s862_s13 = smov 8  }
  0x29   : > { %617 = dma.hbm_to_vmem [thread:$0]  (!%p947_p12), %s1163_s1, 2048, %s940_s25, [#allocation6], %s861_s12, %s861_s12, %s862_s13  }
  0x2a   : > { %p28_p1 = scmp.eq.s32.totalorder %s27_s29, 0  ;;  %p37_p2 = scmp.ne.s32.totalorder %s854_s17, %s850_s16 }
  0x2b   : > { %p38_p4 = scmp.eq.s32.totalorder %s858_s18, 0  ;;  %p627_p6 = scmp.lt.s32.totalorder %s858_s18, 2 }
  0x2c   : > { %s986_s24 = scalar_select %p28_p1, %s854_s17, %s30_s28  }
  0x2d   : > { %p39_p8 = por %p38_p4, %p37_p2  ;;  %p1174_p9 = scmp.eq.s32.totalorder %s916_s19, 1 }
  0x2e   : > { %s169_s26 = sand.u32 1, %s854_s17   ;;  %s511_s5 = sshll.u32 %s858_s18, 8 }
  0x2f   : > { %p990_p11 = por %p1174_p9, %p37_p2  ;;  %s494_s6 = sshll.u32 %s169_s26, 4 }
  0x30   : > { %s999_s9 = scalar_lea.hbm %s1162_s0, %s511_s5  ;;  %s173_s25 = scalar_lea.vmem [#allocation2], %s494_s6 }
  0x31   : > { %s180_s28 = sshll.u32 %s173_s25, 4  ;;  %p1001_p12 = pnand %p627_p6, %p39_p8  ;;  %s1005_s28 = int_to_ptr.vmem [resolvable:$true] %s180_s28 }
  0x32   : > { %s1007_s10 = scalar_lea.sflag [#allocation3], %s169_s26  ;;  %s702_s11 = scalar_lea.hbm %s999_s9, 256 }
  0x33   : > { %p703_p13 = scmp.ne.s32.totalorder %s999_s9, %s702_s11  ;;  %p704_p0 = pneg %p1001_p12 }
  0x34   : > { %s707_s5 = scalar_lea.hbm %s1162_s0, 512  ;;  %p708_p7 = scmp.lt.u32.totalorder %s999_s9, %s1162_s0 }
  0x35   : > { %p705_p3 = pnand %p704_p0, %p703_p13  ;;  %p709_p10 = scmp.lt.u32.totalorder %s707_s5, %s702_s11 }
  0x36   : > { %p711_p2 = scmp.lt.u32.totalorder %s702_s11, %s999_s9 }
  0x37   : > { %p706_p5 = pneg %p705_p3  ;;  %p710_p1 = por %p709_p10, %p708_p7 }
  0x39   : > { %p712_p4 = por %p711_p2, %p710_p1 }
  0x3b   : > { %p713_p6 = pnand %p712_p4, %p706_p5 }
  0x3d   : > { %716 = shalt.err (!%p713_p6)
}
  0x3e   : > { %s717_s26 = scalar_lea.vmem %s1005_s28, 256  ;;  %s863_s8 = smov [#allocation2]  }
  0x3f   : > { %p718_p8 = scmp.ne.s32.totalorder %s1005_s28, %s717_s26  ;;  %s722_s25 = sshll.u32 %s863_s8, 4  ;;  %s723_s25 = int_to_ptr.vmem [resolvable:$false] %s722_s25 }
  0x40   : > { %s724_s14 = scalar_lea.vmem %s723_s25, 512  ;;  %p725_p3 = scmp.lt.s32.totalorder %s1005_s28, %s723_s25 }
  0x41   : > { %p720_p9 = pnand %p718_p8, %p704_p0  ;;  %p726_p7 = scmp.lt.s32.totalorder %s724_s14, %s717_s26 }
  0x43   : > { %p721_p13 = pneg %p720_p9  ;;  %p727_p10 = por %p726_p7, %p725_p3 }
  0x45   : > { %p728_p1 = pnand %p727_p10, %p721_p13 }
  0x47   : > { %731 = shalt.err (!%p728_p1)
}
  0x48   : > { %621 = dma.hbm_to_vmem [thread:$0]  (!%p1001_p12), %s999_s9, 256, %s1005_s28, %s1007_s10, %s861_s12, %s861_s12, %s862_s13  }
  0x49   : > { %p1177_p0 = scmp.ne.s32.totalorder %s1172_s23, 0 }
  0x4a   : > { %s1041_s11 = sand.u32 (!%p1177_p0), 1, %s850_s16   ;;  %p1178_p5 = scmp.ne.s32.totalorder (!%p1177_p0), %s1170_s21, 0 }
  0x4b   : > { %192 = sbr.rel (%p1177_p0) target bundleno = 409 (0x199), region = 28  ;;  %s498_s20 = sshll.u32 (!%p1177_p0), %s1041_s11, 4 }
  0x4c   : > { %s195_s5 = scalar_lea.sflag (!%p1177_p0), [#allocation3], %s1041_s11  ;;  %s1045_s6 = scalar_lea.vmem (!%p1177_p0), [#allocation2], %s498_s20 }
  0x52   : > { %829 = dma.done.wait (%p1178_p5), %s195_s5, 256  }
  0x53   : > { %831 = vsyncadd (%p1178_p5), %s195_s5, 4294967040  ;;  %p1179_p12 = scmp.eq.s32.totalorder %s916_s19, 0 }
  0x55   : > { %833 = dma.done.wait (%p1179_p12), [#allocation6], 2048   ;;  %p1180_p2 = pmov %p1179_p12 }
  0x56   : > { %s1055_s23 = scalar_lea.vmem [#allocation7], %s498_s20  ;;  %p1181_p4 = scmp.ne.s32.totalorder %s916_s19, 0 }
  0x57   : > { %835 = vsyncadd (%p1180_p2), [#allocation6], 4294965248  ;;  %v864_v0 = vmov (!%p1181_p4), 0.0  }
  0x58   : > { %230 = sbr.rel (%p1181_p4) target bundleno = 95 (0x5f), region = 40  ;;  %231 = vst [vmem:[#allocation8] sm:$0x1] (!%p1181_p4), %v864_v0  ;;  %232 = vst [vmem:[#allocation10] sm:$0x1] (!%p1181_p4), %v864_v0 }
  0x5f PF: > { %v235_v1 = vld [vmem:[#allocation5] sm:$0xff]  ;;  %v236_v2 = vld [vmem:[#allocation5 + $0x8] sm:$0xff]  ;;  %v237_v3 = vld [vmem:[#allocation5 + $0x10] sm:$0xff]  ;;  %s512_s21 = sshll.u32 %s916_s19, 8  ;;  %s364_s12 = sshll.u32 %s1055_s23, 4  ;;  %s1068_s12 = int_to_ptr.vmem [resolvable:$true] %s364_s12 }
  0x60   : > { %v566_v4 = vpack.c.bf16 %v236_v2, %v235_v1  ;;  %v238_v5 = vld [vmem:[#allocation5 + $0x18] sm:$0xff]  ;;  %v239_v7 = vld [vmem:[#allocation5 + $0x20] sm:$0xff]  ;;  %v240_v8 = vld [vmem:[#allocation5 + $0x28] sm:$0xff]  ;;  %s1066_s28 = scalar_lea.hbm %s1164_s2, %s512_s21  ;;  %s351_s29 = scalar_lea.sflag [#allocation4], %s1041_s11 }
  0x61   : > { %v570_v6 = vpack.c.bf16 %v238_v5, %v237_v3  ;;  %v574_v9 = vpack.c.bf16 %v240_v8, %v239_v7  ;;  %v233_v10 = vld [vmem:[%s1045_s6] sm:$0xff]  ;;  %v242_v12 = vld [vmem:[#allocation5 + $0x38] sm:$0xff]  ;;  %v244_v15 = vld [vmem:[#allocation5 + $0x48] sm:$0xff]  ;;  %s732_s10 = scalar_lea.vmem %s1068_s12, 256  ;;  %s865_s7 = smov [#allocation7]  }
  0x62   : > { %567 = vmatprep.subr.bf16.mxu0 %v566_v4  ;;  %v241_v11 = vld [vmem:[#allocation5 + $0x30] sm:$0xff]  ;;  %563 = vmatprep.mubr.f32.mxu0 %v233_v10  ;;  %v243_v14 = vld [vmem:[#allocation5 + $0x40] sm:$0xff]  ;;  %v246_v18 = vld [vmem:[#allocation5 + $0x58] sm:$0xff]  ;;  %p733_p6 = scmp.ne.s32.totalorder %s1068_s12, %s732_s10  ;;  %s736_s26 = sshll.u32 %s865_s7, 4  ;;  %s737_s26 = int_to_ptr.vmem [resolvable:$false] %s736_s26 }
  0x63   : > { %569 = vmatpush3.bf16.msra.mxu0 %v566_v4  ;;  %v578_v13 = vpack.c.bf16 %v242_v12, %v241_v11  ;;  %v582_v16 = vpack.c.bf16 %v244_v15, %v243_v14  ;;  %v245_v17 = vld [vmem:[#allocation5 + $0x50] sm:$0xff]  ;;  %v247_v20 = vld [vmem:[#allocation5 + $0x60] sm:$0xff]  ;;  %v248_v21 = vld [vmem:[#allocation5 + $0x68] sm:$0xff]  ;;  %s738_s8 = scalar_lea.vmem %s737_s26, 512  ;;  %p739_p13 = scmp.lt.s32.totalorder %s1068_s12, %s737_s26 }
  0x64   : > { %571 = vmatprep.subr.bf16.mxu0 %v570_v6  ;;  %v586_v19 = vpack.c.bf16 %v246_v18, %v245_v17  ;;  %v590_v22 = vpack.c.bf16 %v248_v21, %v247_v20  ;;  %v249_v23 = vld [vmem:[#allocation5 + $0x70] sm:$0xff]  ;;  %v250_v24 = vld [vmem:[#allocation5 + $0x78] sm:$0xff]  ;;  %p734_p8 = pnand %p733_p6, %p990_p11  ;;  %p740_p3 = scmp.lt.s32.totalorder %s738_s8, %s732_s10 }
  0x65   : > { %v594_v25 = vpack.c.bf16 %v250_v24, %v249_v23  ;;  %v234_v26 = vld [vmem:[%s1045_s6 + $0x8] sm:$0xff] }
  0x66   : > { %p735_p9 = pneg %p734_p8  ;;  %p741_p7 = por %p740_p3, %p739_p13 }
  0x67   : > { %573 = vmatpush3.bf16.msra.mxu0 %v570_v6 }
  0x68   : > { %575 = vmatprep.subr.bf16.mxu0 %v574_v9  ;;  %p742_p10 = pnand %p741_p7, %p735_p9 }
  0x6b   : > { %577 = vmatpush3.bf16.msra.mxu0 %v574_v9 }
  0x6c   : > { %579 = vmatprep.subr.bf16.mxu0 %v578_v13 }
  0x6f   : > { %581 = vmatpush3.bf16.msra.mxu0 %v578_v13 }
  0x70   : > { %583 = vmatprep.subr.bf16.mxu0 %v582_v16 }
  0x73   : > { %585 = vmatpush3.bf16.msra.mxu0 %v582_v16 }
  0x74   : > { %587 = vmatprep.subr.bf16.mxu0 %v586_v19 }
  0x77   : > { %589 = vmatpush3.bf16.msra.mxu0 %v586_v19 }
  0x78   : > { %591 = vmatprep.subr.bf16.mxu0 %v590_v22 }
  0x7b   : > { %593 = vmatpush3.bf16.msra.mxu0 %v590_v22 }
  0x7c   : > { %595 = vmatprep.subr.bf16.mxu0 %v594_v25 }
  0x7f   : > { %597 = vmatpush3.bf16.msra.mxu0 %v594_v25 }
  0x82   : > { %564 = vmatmul.mubr.f32.vlgmr.msra.gmra.mrb[0].mxu0 %v234_v26 }
 0x155   : > { %v565_v27 = vpop.f32.mrb[0].mxu0 }
 0x156   : > { %327 = vst [vmem:[%s1055_s23 + $0x8] sm:$0xff] %v565_v27  ;;  %v340_v28 = vmul.f32 %v565_v27, %v565_v27  ;;  %v317_v29 = vpop.f32.mrb[1].mxu0 }
 0x157   : > { %326 = vst [vmem:[%s1055_s23] sm:$0xff] %v317_v29  ;;  %v329_v30 = vadd.f32 %v565_v27, %v317_v29  ;;  %v339_v31 = vmul.f32 %v317_v29, %v317_v29 }
 0x158   : > { %745 = shalt.err (!%p742_p10)
}
 0x159   : > { %s746_s25 = scalar_lea.hbm %s1066_s28, 256  ;;  %s750_s5 = scalar_lea.hbm %s1164_s2, 512 }
 0x15a   : > { %p747_p1 = scmp.ne.s32.totalorder %s1066_s28, %s746_s25  ;;  %p751_p12 = scmp.lt.u32.totalorder %s1066_s28, %s1164_s2 }
 0x15b   : > { %p752_p2 = scmp.lt.u32.totalorder %s750_s5, %s746_s25  ;;  %p754_p6 = scmp.lt.u32.totalorder %s746_s25, %s1066_s28 }
 0x15c   : > { %p748_p0 = pnand %p747_p1, %p990_p11 }
 0x15d   : > { %p753_p4 = por %p752_p2, %p751_p12 }
 0x15e   : > { %p749_p5 = pneg %p748_p0 }
 0x15f   : > { %p755_p8 = por %p754_p6, %p753_p4 }
 0x161   : > { %p756_p9 = pnand %p755_p8, %p749_p5 }
 0x163   : > { %759 = shalt.err (!%p756_p9)
}
 0x164   : > { %s866_s21 = smov 128   ;;  %s867_s13 = smov 8   ;;  %v330_v32 = vrot.slane %v329_v30, 4  ;;  %v341_v33 = vadd.f32 %v340_v28, %v339_v31  ;;  %v328_v42 = vld [vmem:[#allocation8] sm:$0x1] }
 0x165   : > { %604 = dma.vmem_to_hbm [thread:$0]  (%p990_p11), %s1068_s12, 256, %s1066_s28, %s351_s29, %s866_s21, %s866_s21, %s867_s13   ;;  %v338_v45 = vld [vmem:[#allocation10] sm:$0x1] }
 0x166   : > { %v331_v34 = vadd.f32 %v330_v32, %v329_v30  ;;  %v342_v35 = vrot.slane %v341_v33, 4  ;;  %s868_s9 = smov [#allocation8]   ;;  %s869_s30 = smov [#allocation10]  }
 0x167   : > { %s378_s10 = sshll.u32 %s868_s9, 4  ;;  %s389_s11 = sshll.u32 %s869_s30, 4  ;;  %s379_s10 = int_to_ptr.vmem [resolvable:$true] %s378_s10  ;;  %s1096_s11 = int_to_ptr.vmem [resolvable:$true] %s389_s11 }
 0x168   : > { %v332_v36 = vrot.slane %v331_v34, 2  ;;  %v343_v37 = vadd.f32 %v342_v35, %v341_v33  ;;  %s760_s12 = scalar_lea.vmem %s379_s10, 16  ;;  %p1182_p13 = scmp.eq.s32.totalorder %s916_s19, 1 }
 0x169   : > { %p761_p11 = scmp.ne.s32.totalorder %s379_s10, %s760_s12  ;;  %s766_s28 = scalar_lea.vmem %s379_s10, 32 }
 0x16a   : > { %v333_v38 = vadd.f32 %v332_v36, %v331_v34  ;;  %v344_v39 = vrot.slane %v343_v37, 2  ;;  %p767_p10 = scmp.lt.s32.totalorder %s379_s10, %s379_s10  ;;  %p768_p1 = scmp.lt.s32.totalorder %s766_s28, %s760_s12 }
 0x16b   : > { %p762_p3 = pnand %p761_p11, %p1182_p13 }
 0x16c   : > { %v334_v40 = vrot.slane %v333_v38, 1  ;;  %v345_v41 = vadd.f32 %v344_v39, %v343_v37  ;;  %p769_p0 = por %p768_p1, %p767_p10 }
 0x16d   : > { %p763_p7 = pneg %p762_p3 }
 0x16e   : > { %v335_v43 = vadd.f32 %v334_v40, %v333_v38  ;;  %v346_v44 = vrot.slane %v345_v41, 1 }
 0x16f   : > { %p770_p5 = pnand %p769_p0, %p763_p7 }
 0x170   : > { %v336_v46 = vadd.f32 %v335_v43, %v328_v42  ;;  %v347_v47 = vadd.f32 %v346_v44, %v345_v41 }
 0x172   : > { %337 = vst [vmem:[#allocation8] sm:$0x1] %v336_v46  ;;  %v348_v48 = vadd.f32 %v347_v47, %v338_v45 }
 0x173   : > { %773 = shalt.err (!%p770_p5)
}
 0x174   : > { %s774_s26 = scalar_lea.hbm %s1165_s3, 16  ;;  %p1183_p2 = pmov %p1182_p13 }
 0x175   : > { %p775_p12 = scmp.ne.s32.totalorder %s1165_s3, %s774_s26  ;;  %p780_p8 = scmp.lt.u32.totalorder %s774_s26, %s1165_s3 }
 0x177   : > { %p776_p4 = pnand %p775_p12, %p1183_p2 }
 0x179   : > { %p777_p6 = pneg %p776_p4 }
 0x17b   : > { %p782_p9 = pnand %p780_p8, %p777_p6 }
 0x17d   : > { %785 = shalt.err (!%p782_p9)
}
 0x17e   : > { %p1184_p11 = pmov %p1183_p2  ;;  %349 = vst [vmem:[#allocation10] sm:$0x1] %v348_v48  ;;  %s786_s23 = scalar_lea.vmem %s1096_s11, 16 }
 0x17f   : > { %p787_p13 = scmp.ne.s32.totalorder %s1096_s11, %s786_s23  ;;  %p1185_p3 = pmov %p1183_p2 }
 0x180   : > { %606 = dma.vmem_to_hbm [thread:$0]  (%p1184_p11), %s379_s10, 16, %s1165_s3, [#allocation9]  }
 0x181   : > { %p788_p7 = pnand %p787_p13, %p1185_p3  ;;  %s792_s21 = scalar_lea.vmem %s1096_s11, 32 }
 0x182   : > { %p793_p1 = scmp.lt.s32.totalorder %s1096_s11, %s1096_s11  ;;  %p794_p0 = scmp.lt.s32.totalorder %s792_s21, %s786_s23 }
 0x183   : > { %p789_p10 = pneg %p788_p7 }
 0x184   : > { %p795_p5 = por %p794_p0, %p793_p1 }
 0x186   : > { %p796_p12 = pnand %p795_p5, %p789_p10 }
 0x188   : > { %799 = shalt.err (!%p796_p12)
}
 0x189   : > { %s800_s30 = scalar_lea.hbm %s1166_s4, 16  ;;  %p1186_p4 = pmov %p1185_p3 }
 0x18a   : > { %p801_p2 = scmp.ne.s32.totalorder %s1166_s4, %s800_s30  ;;  %p806_p9 = scmp.lt.u32.totalorder %s800_s30, %s1166_s4 }
 0x18c   : > { %p802_p6 = pnand %p801_p2, %p1186_p4 }
 0x18e   : > { %p803_p8 = pneg %p802_p6 }
 0x190   : > { %p808_p11 = pnand %p806_p9, %p803_p8 }
 0x192   : > { %811 = shalt.err (!%p808_p11)
}
 0x193   : > { %p1187_p13 = pmov %p1185_p3 }
 0x195   : > { %608 = dma.vmem_to_hbm [thread:$0]  (%p1187_p13), %s1096_s11, 16, %s1166_s4, [#allocation9]  }
 0x196   : > { %837 = dma.done.wait (%p1185_p3), [#allocation9], 32   ;;  %p1188_p7 = pmov %p1185_p3 }
 0x198   : > { %839 = vsyncadd (%p1188_p7), [#allocation9], 4294967264 }
 0x199 PF: > { %s409_s8 = sand.u32 1, %s846_s15   ;;  %p1189_p10 = scmp.ne.s32.totalorder %s1171_s22, 0 }
 0x19a   : > { %p1190_p1 = scmp.ge.s32.totalorder %s858_s18, 2  ;;  %s410_s25 = scalar_lea.sflag [#allocation4], %s409_s8 }
 0x19c   : > { %p623_p0 = pnand %p1190_p1, %p1189_p10 }
 0x19e   : > { %841 = dma.done.wait (!%p623_p0), %s410_s25, 256  }
 0x19f   : > { %843 = vsyncadd (!%p623_p0), %s410_s25, 4294967040  ;;  %p20_p5 = scmp.ge.s32.totalorder %s952_s27, 4   ;;  %s1191_s15 = smov %s850_s16 }
 0x1a0   : > { %s1192_s16 = smov %s854_s17  ;;  %s1193_s17 = smov %s986_s24 }
 0x1a1   : > { %s1194_s18 = smov %s952_s27  ;;  %22 = sbr.rel (!%p20_p5) target bundleno = 7 (0x7), region = 97 }
 0x1a8   :  { %415 = vsyncpa [#allocation3], 1 }
 0x1a9   :  { %417 = vsyncpa [#allocation3 + $0x1], 1 }
 0x1aa   :  { %418 = vsyncpa [#allocation6], 1 }
 0x1ab   :  { %419 = vsyncpa [#allocation4], 1 }
 0x1ac   :  { %421 = vsyncpa [#allocation4 + $0x1], 1 }
 0x1ad   :  { %422 = vsyncpa [#allocation9], 1 }

</bundles_post_ra>
